<compile_context>
chip_gen: v7x
topology: tpu7x:2x2x1
jax: 0.10.0
libtpu: 0.0.40
codegen_flags: <defaults>
</compile_context>

<pallas_src>
import math
from functools import partial

import jax
import jax.numpy as jnp
import numpy as np
from jax import lax
from jax.experimental import pallas as pl
from jax.experimental.pallas import tpu as pltpu


# ----------------------------- Pallas kernels ------------------------------ #

def _kv_stats_kernel(k_ref, v_ref, p_ref, m_ref, s1_ref, s2_ref, sv_ref, *,
                     data_normalizer, nb_features):
    """Accumulate per-batch key-feature statistics over N-tiles (online max)."""
    t = pl.program_id(1)

    @pl.when(t == 0)
    def _():
        m_ref[...] = jnp.full_like(m_ref, -jnp.inf)
        s1_ref[...] = jnp.zeros_like(s1_ref)
        s2_ref[...] = jnp.zeros_like(s2_ref)
        sv_ref[...] = jnp.zeros_like(sv_ref)

    k = k_ref[0]                                    # (tile_n, D) bf16
    v = v_ref[0].astype(jnp.float32)                # (tile_n, E) f32
    p = p_ref[...]                                  # (M_pad, D) bf16

    # dn * k @ P^T on the MXU (bf16 operands, f32 accumulation).
    dk = data_normalizer * lax.dot_general(
        k, p, (((1,), (1,)), ((), ())), preferred_element_type=jnp.float32)   # (tile_n, M_pad)
    k32 = k.astype(jnp.float32)
    knorm = jnp.sum(k32 * k32, axis=-1, keepdims=True) * (0.5 * data_normalizer ** 2)

    m_pad = dk.shape[-1]
    valid = lax.broadcasted_iota(jnp.int32, (1, m_pad), 1) < nb_features
    dk = jnp.where(valid, dk, -jnp.inf)             # padded features never contribute

    tile_max = jnp.max(jnp.max(dk, axis=-1, keepdims=True), axis=0, keepdims=True)  # (1, 1)
    m_old = m_ref[0]                                # (1, 1)
    m_new = jnp.maximum(m_old, tile_max)            # (1, 1)
    scale = jnp.exp(m_old - m_new)                  # 0.0 on the first tile (exp(-inf))

    e = jnp.exp(dk - knorm - m_new)                 # (tile_n, M_pad); padded cols exactly 0

    s1_ref[0] = scale * s1_ref[0] + jnp.sum(e, axis=0, keepdims=True)            # (1, M_pad)
    s2_ref[0] = scale * s2_ref[0] + lax.dot_general(                              # (M_pad, E)
        e, v, (((0,), (0,)), ((), ())), preferred_element_type=jnp.float32)
    sv_ref[0] = sv_ref[0] + jnp.sum(v, axis=0, keepdims=True)                     # (1, E)
    m_ref[0] = m_new


def _performer_out_kernel(q_ref, p_ref, m_ref, kmax_ref, s1_ref, s2_ref, sv_ref,
                          o_ref, *, data_normalizer, ratio, eps, nb_features,
                          seq_len):
    """Query feature map + fused normalization + linear attention for one block."""
    q = q_ref[0]                                    # (tile_n, D) bf16
    p = p_ref[...]                                  # (M_pad, D) bf16

    dq = data_normalizer * lax.dot_general(
        q, p, (((1,), (1,)), ((), ())), preferred_element_type=jnp.float32)   # (tile_n, M_pad)
    q32 = q.astype(jnp.float32)
    qnorm = jnp.sum(q32 * q32, axis=-1, keepdims=True) * (0.5 * data_normalizer ** 2)

    m_pad = dq.shape[-1]
    valid = lax.broadcasted_iota(jnp.int32, (1, m_pad), 1) < nb_features
    dq = jnp.where(valid, dq, -jnp.inf)
    row_max = jnp.max(dq, axis=-1, keepdims=True)                              # (tile_n, 1)

    phi_q = ratio * (jnp.exp(dq - qnorm - row_max) + eps)
    phi_q = jnp.where(valid, phi_q, 0.0)            # padded features exactly 0

    # Per-batch normalization (tiny VPU work; keeps the (B, M_pad, E) rescaled
    # context out of HBM entirely -- it is formed on the fly from the raw stats).
    rescale = jnp.exp(m_ref[0] - kmax_ref[...])                                # (1, 1)
    kcs = ratio * (rescale * s1_ref[0] + eps * seq_len)                        # (1, M_pad)
    ctx = ratio * (rescale * s2_ref[0] + eps * sv_ref[0])                      # (M_pad, E)

    denom = jnp.sum(phi_q * kcs, axis=-1, keepdims=True)                       # (tile_n, 1)
    out = jnp.dot(phi_q, ctx, preferred_element_type=jnp.float32)              # (tile_n, E)
    out = out * pl.reciprocal(denom, approx=True)   # EUP reciprocal instead of VALU divide
    o_ref[0] = out.astype(o_ref.dtype)


# --------------------------- parameter init (glue) -------------------------- #

def gaussian_orthogonal_random_matrix(key, nb_rows, nb_cols):
    """Same construction as the PyTorch module (QR of Gaussian blocks)."""
    nb_full_blocks = nb_rows // nb_cols
    keys = jax.random.split(key, nb_full_blocks + 2)
    blocks = []
    for i in range(nb_full_blocks):
        u = jax.random.normal(keys[i], (nb_cols, nb_cols), dtype=jnp.float32)
        qm, _ = jnp.linalg.qr(u)
        blocks.append(qm.T)
    remaining = nb_rows - nb_full_blocks * nb_cols
    if remaining > 0:
        u = jax.random.normal(keys[nb_full_blocks], (nb_cols, nb_cols), dtype=jnp.float32)
        qm, _ = jnp.linalg.qr(u)
        blocks.append(qm.T[:remaining])
    final = jnp.concatenate(blocks, axis=0)                         # (M, D)
    multiplier = jnp.linalg.norm(
        jax.random.normal(keys[-1], (nb_rows, nb_cols), dtype=jnp.float32), axis=1)
    return multiplier[:, None] * final


# ------------------------------- wrapper ----------------------------------- #

def _choose_tile_n(n):
    for c in (2048, 1024, 512, 256, 128, 64, 32, 16):
        if n % c == 0:
            return c
    return n   # fall back to the full (untiled) sequence


def performer_attention(q, k, v, projection_matrix, *, tile_n=None):
    B, N, D = q.shape
    E = v.shape[-1]
    M = projection_matrix.shape[0]
    M_pad = ((M + 127) // 128) * 128          # lane-align the feature dim
    data_normalizer = float(D) ** -0.25
    ratio = float(M) ** -0.5
    eps = 1e-4

    if tile_n is None:
        tile_n = _choose_tile_n(N)
    assert N % tile_n == 0
    nt = N // tile_n

    # bf16 storage / MXU operands for q, k, P (halves their HBM+VMEM bytes);
    # v and everything past the projection matmuls stay f32.
    q_b = q.astype(jnp.bfloat16)
    k_b = k.astype(jnp.bfloat16)
    proj_p = jnp.pad(projection_matrix.astype(jnp.bfloat16), ((0, M_pad - M), (0, 0)))

    cparams_kv = pltpu.CompilerParams(
        dimension_semantics=("parallel", "arbitrary"),
        vmem_limit_bytes=32 * 1024 * 1024)
    cparams_out = pltpu.CompilerParams(
        dimension_semantics=("parallel", "parallel"),
        vmem_limit_bytes=32 * 1024 * 1024)

    # ---- pass 1: per-batch key statistics (k, v each read from HBM once) ----
    m_b, s1, s2, sv = pl.pallas_call(
        partial(_kv_stats_kernel, data_normalizer=data_normalizer, nb_features=M),
        grid=(B, nt),
        in_specs=[pl.BlockSpec((1, tile_n, D), lambda b, t: (b, t, 0)),   # k
                  pl.BlockSpec((1, tile_n, E), lambda b, t: (b, t, 0)),   # v
                  pl.BlockSpec((M_pad, D), lambda b, t: (0, 0))],         # P (VMEM-resident)
        out_specs=[pl.BlockSpec((1, 1, 1), lambda b, t: (b, 0, 0)),       # m_b
                   pl.BlockSpec((1, 1, M_pad), lambda b, t: (b, 0, 0)),   # S1
                   pl.BlockSpec((1, M_pad, E), lambda b, t: (b, 0, 0)),   # S2
                   pl.BlockSpec((1, 1, E), lambda b, t: (b, 0, 0))],      # sum_v
        out_shape=(jax.ShapeDtypeStruct((B, 1, 1), jnp.float32),
                   jax.ShapeDtypeStruct((B, 1, M_pad), jnp.float32),
                   jax.ShapeDtypeStruct((B, M_pad, E), jnp.float32),
                   jax.ShapeDtypeStruct((B, 1, E), jnp.float32)),
        compiler_params=cparams_kv,
    )(k_b, v, proj_p)

    # ---- tiny host glue: only the global key max (== torch.max(data_dash)) ----
    kmax = jnp.max(m_b).reshape(1, 1)                # (1, 1)

    # ---- pass 2: query features + fused normalization + linear attention ----
    out = pl.pallas_call(
        partial(_performer_out_kernel, data_normalizer=data_normalizer,
                ratio=ratio, eps=eps, nb_features=M, seq_len=float(N)),
        grid=(B, nt),
        in_specs=[pl.BlockSpec((1, tile_n, D), lambda b, t: (b, t, 0)),   # q
                  pl.BlockSpec((M_pad, D), lambda b, t: (0, 0)),          # P (VMEM-resident)
                  pl.BlockSpec((1, 1, 1), lambda b, t: (b, 0, 0)),        # m_b
                  pl.BlockSpec((1, 1), lambda b, t: (0, 0)),              # kmax
                  pl.BlockSpec((1, 1, M_pad), lambda b, t: (b, 0, 0)),    # S1
                  pl.BlockSpec((1, M_pad, E), lambda b, t: (b, 0, 0)),    # S2
                  pl.BlockSpec((1, 1, E), lambda b, t: (b, 0, 0))],       # sum_v
        out_specs=pl.BlockSpec((1, tile_n, E), lambda b, t: (b, t, 0)),
        out_shape=jax.ShapeDtypeStruct((B, N, E), jnp.float32),
        compiler_params=cparams_out,
    )(q_b, proj_p, m_b, kmax, s1, s2, sv)
    return out


# ----------------------- pure-JAX reference (checking) ---------------------- #

def performer_attention_ref(q, k, v, P):
    """Reference mirroring the kernel's precision policy: q/k/P rounded to bf16
    for the projection matmuls (bf16xbf16 products are exact in f32), everything
    else in f32. Semantics are otherwise identical to the PyTorch module."""
    D = q.shape[-1]
    M = P.shape[0]
    dn = float(D) ** -0.25
    ratio = float(M) ** -0.5
    eps = 1e-4
    qb = q.astype(jnp.bfloat16).astype(jnp.float32)
    kb = k.astype(jnp.bfloat16).astype(jnp.float32)
    Pb = P.astype(jnp.bfloat16).astype(jnp.float32)
    dq = dn * jnp.einsum('bnd,md->bnm', qb, Pb)
    dk = dn * jnp.einsum('bnd,md->bnm', kb, Pb)
    qn = jnp.sum(qb * qb, -1, keepdims=True) * 0.5 * dn ** 2
    kn = jnp.sum(kb * kb, -1, keepdims=True) * 0.5 * dn ** 2
    phi_q = ratio * (jnp.exp(dq - qn - jnp.max(dq, -1, keepdims=True)) + eps)
    phi_k = ratio * (jnp.exp(dk - kn - jnp.max(dk)) + eps)
    k_cumsum = phi_k.sum(-2)
    d_inv = 1.0 / jnp.einsum('bnm,bm->bn', phi_q, k_cumsum)
    context = jnp.einsum('bnm,bne->bme', phi_k, v)
    return jnp.einsum('bme,bnm,bn->bne', context, phi_q, d_inv)


if __name__ == "__main__":
    dim_heads = 16
    nb_features = int(dim_heads * math.log(dim_heads))  # 44 (padded to 128 inside the wrapper)
    B, N, E = 4, 8, 16   # B = batch(2) * heads(2) folded

    key = jax.random.PRNGKey(0)
    kq, kk, kv, kp = jax.random.split(key, 4)
    q = jax.random.normal(kq, (B, N, dim_heads), dtype=jnp.float32)
    k = jax.random.normal(kk, (B, N, dim_heads), dtype=jnp.float32)
    v = jax.random.normal(kv, (B, N, E), dtype=jnp.float32)
    proj = gaussian_orthogonal_random_matrix(kp, nb_features, dim_heads)

    out = jax.block_until_ready(performer_attention(q, k, v, proj))
    ref = performer_attention_ref(q, k, v, proj)
    assert out.shape == (B, N, E)
    # Tolerance covers the approximate EUP reciprocal and accumulation-order noise.
    np.testing.assert_allclose(np.asarray(out), np.asarray(ref), rtol=2e-2, atol=2e-2)
    print("KERNEL_OK")
</pallas_src>

<mosaic_0001>
module attributes {stable_mosaic.version = 11 : i64} {
  func.func @_kv_stats_kernel(%arg0: i32, %arg1: i32, %arg2: memref<1x8x16xbf16, #tpu.memory_space<vmem>>, %arg3: memref<1x8x16xf32, #tpu.memory_space<vmem>>, %arg4: memref<128x16xbf16, #tpu.memory_space<vmem>>, %arg5: memref<1x1x1xf32, #tpu.memory_space<vmem>>, %arg6: memref<1x1x128xf32, #tpu.memory_space<vmem>>, %arg7: memref<1x128x16xf32, #tpu.memory_space<vmem>>, %arg8: memref<1x1x16xf32, #tpu.memory_space<vmem>>) attributes {dimension_semantics = [#tpu.dimension_semantics<parallel>, #tpu.dimension_semantics<arbitrary>], iteration_bounds = array<i64: 4, 1>, scalar_prefetch = 0 : i64, scratch_operands = 0 : i64, tpu.core_type = #tpu.core_type<tc>, window_params = [{transform_indices = @transform_0, window_bounds = array<i64: 1, 8, 16>}, {transform_indices = @transform_1, window_bounds = array<i64: 1, 8, 16>}, {pipeline_mode = #tpu.pipeline_mode<synchronous>, transform_indices = @transform_2, window_bounds = array<i64: 128, 16>}, {transform_indices = @transform_3, window_bounds = array<i64: 1, 1, 1>}, {transform_indices = @transform_4, window_bounds = array<i64: 1, 1, 128>}, {transform_indices = @transform_5, window_bounds = array<i64: 1, 128, 16>}, {transform_indices = @transform_6, window_bounds = array<i64: 1, 1, 16>}]} {
    %c0_i32 = arith.constant 0 : i32
    %0 = arith.cmpi eq, %arg1, %c0_i32 : i32
    %1 = arith.extui %0 : i1 to i32
    %c0_i32_0 = arith.constant 0 : i32
    %2 = arith.cmpi ne, %1, %c0_i32_0 : i32
    scf.if %2 {
      %cst_41 = arith.constant 0xFF800000 : f32
      %68 = vector.broadcast %cst_41 : f32 to vector<1x1x1xf32>
      %c0_42 = arith.constant 0 : index
      %c0_43 = arith.constant 0 : index
      %c0_44 = arith.constant 0 : index
      %69 = vector.load %arg5[%c0_42, %c0_43, %c0_44] : memref<1x1x1xf32, #tpu.memory_space<vmem>>, vector<1x1x1xf32>
      tpu.vector_store %arg5[%c0_42, %c0_43, %c0_44], %68 {strides = array<i32>} : memref<1x1x1xf32, #tpu.memory_space<vmem>>, vector<1x1x1xf32>,
      %cst_45 = arith.constant 0.000000e+00 : f32
      %70 = vector.broadcast %cst_45 : f32 to vector<1x1x128xf32>
      %c0_46 = arith.constant 0 : index
      %c0_47 = arith.constant 0 : index
      %c0_48 = arith.constant 0 : index
      %71 = vector.load %arg6[%c0_46, %c0_47, %c0_48] : memref<1x1x128xf32, #tpu.memory_space<vmem>>, vector<1x1x128xf32>
      tpu.vector_store %arg6[%c0_46, %c0_47, %c0_48], %70 {strides = array<i32>} : memref<1x1x128xf32, #tpu.memory_space<vmem>>, vector<1x1x128xf32>,
      %cst_49 = arith.constant 0.000000e+00 : f32
      %72 = vector.broadcast %cst_49 : f32 to vector<1x128x16xf32>
      %c0_50 = arith.constant 0 : index
      %c0_51 = arith.constant 0 : index
      %c0_52 = arith.constant 0 : index
      %73 = vector.load %arg7[%c0_50, %c0_51, %c0_52] : memref<1x128x16xf32, #tpu.memory_space<vmem>>, vector<1x128x16xf32>
      tpu.vector_store %arg7[%c0_50, %c0_51, %c0_52], %72 {strides = array<i32>} : memref<1x128x16xf32, #tpu.memory_space<vmem>>, vector<1x128x16xf32>,
      %cst_53 = arith.constant 0.000000e+00 : f32
      %74 = vector.broadcast %cst_53 : f32 to vector<1x1x16xf32>
      %c0_54 = arith.constant 0 : index
      %c0_55 = arith.constant 0 : index
      %c0_56 = arith.constant 0 : index
      %75 = vector.load %arg8[%c0_54, %c0_55, %c0_56] : memref<1x1x16xf32, #tpu.memory_space<vmem>>, vector<1x1x16xf32>
      tpu.vector_store %arg8[%c0_54, %c0_55, %c0_56], %74 {strides = array<i32>} : memref<1x1x16xf32, #tpu.memory_space<vmem>>, vector<1x1x16xf32>,
    } else {
    }
    %c0 = arith.constant 0 : index
    %c0_1 = arith.constant 0 : index
    %c0_2 = arith.constant 0 : index
    %3 = vector.load %arg2[%c0, %c0_1, %c0_2] : memref<1x8x16xbf16, #tpu.memory_space<vmem>>, vector<1x8x16xbf16>
    %4 = vector.shape_cast %3 : vector<1x8x16xbf16> to vector<8x16xbf16>
    %c0_3 = arith.constant 0 : index
    %c0_4 = arith.constant 0 : index
    %c0_5 = arith.constant 0 : index
    %5 = vector.load %arg3[%c0_3, %c0_4, %c0_5] : memref<1x8x16xf32, #tpu.memory_space<vmem>>, vector<1x8x16xf32>
    %6 = vector.shape_cast %5 : vector<1x8x16xf32> to vector<8x16xf32>
    %c0_6 = arith.constant 0 : index
    %c0_7 = arith.constant 0 : index
    %7 = vector.load %arg4[%c0_6, %c0_7] : memref<128x16xbf16, #tpu.memory_space<vmem>>, vector<128x16xbf16>
    %cst = arith.constant dense<0.000000e+00> : vector<8x128xf32>
    %8 = tpu.matmul %4, %7, %cst {dimension_numbers = #tpu.dot_dimension_numbers<[1], [1], [0], [0], [0, 0, 1, 0], [], []>} : vector<8x16xbf16>, vector<128x16xbf16>, vector<8x128xf32> -> vector<8x128xf32>
    %cst_8 = arith.constant 5.000000e-01 : f32
    %9 = vector.broadcast %cst_8 : f32 to vector<8x128xf32>
    %10 = arith.mulf %9, %8 : vector<8x128xf32>
    %11 = arith.extf %4 : vector<8x16xbf16> to vector<8x16xf32>
    %12 = arith.mulf %11, %11 : vector<8x16xf32>
    %cst_9 = arith.constant dense<0.000000e+00> : vector<8xf32>
    %13 = vector.multi_reduction <add>, %12, %cst_9 [1] : vector<8x16xf32> to vector<8xf32>
    %14 = vector.shape_cast %13 : vector<8xf32> to vector<8x1xf32>
    %cst_10 = arith.constant 1.250000e-01 : f32
    %15 = vector.broadcast %cst_10 : f32 to vector<8x1xf32>
    %16 = arith.mulf %14, %15 : vector<8x1xf32>
    %17 = tpu.iota {dimensions = array<i32: 1>} : vector<1x128xi32>
    %c44_i32 = arith.constant 44 : i32
    %18 = vector.broadcast %c44_i32 : i32 to vector<1x128xi32>
    %19 = arith.cmpi slt, %17, %18 : vector<1x128xi32>
    %cst_11 = arith.constant 0xFF800000 : f32
    %20 = vector.shape_cast %19 : vector<1x128xi1> to vector<1x128xi1>
    %21 = vector.broadcast %20 : vector<1x128xi1> to vector<8x128xi1>
    %22 = vector.broadcast %cst_11 : f32 to vector<8x128xf32>
    %23 = arith.select %21, %10, %22 : vector<8x128xi1>, vector<8x128xf32>
    %cst_12 = arith.constant dense<0xFF800000> : vector<8xf32>
    %24 = vector.multi_reduction <maximumf>, %23, %cst_12 [1] : vector<8x128xf32> to vector<8xf32>
    %25 = vector.shape_cast %24 : vector<8xf32> to vector<8x1xf32>
    %cst_13 = arith.constant dense<0xFF800000> : vector<1xf32>
    %26 = vector.multi_reduction <maximumf>, %25, %cst_13 [0] : vector<8x1xf32> to vector<1xf32>
    %27 = vector.shape_cast %26 : vector<1xf32> to vector<1x1xf32>
    %c0_14 = arith.constant 0 : index
    %c0_15 = arith.constant 0 : index
    %c0_16 = arith.constant 0 : index
    %28 = vector.load %arg5[%c0_14, %c0_15, %c0_16] : memref<1x1x1xf32, #tpu.memory_space<vmem>>, vector<1x1x1xf32>
    %29 = vector.shape_cast %28 : vector<1x1x1xf32> to vector<1x1xf32>
    %30 = arith.maximumf %29, %27 : vector<1x1xf32>
    %31 = arith.subf %29, %30 : vector<1x1xf32>
    %32 = math.exp %31 : vector<1x1xf32>
    %33 = vector.broadcast %16 : vector<8x1xf32> to vector<8x128xf32>
    %34 = arith.subf %23, %33 : vector<8x128xf32>
    %35 = vector.broadcast %30 : vector<1x1xf32> to vector<8x128xf32>
    %36 = arith.subf %34, %35 : vector<8x128xf32>
    %37 = math.exp %36 : vector<8x128xf32>
    %c0_17 = arith.constant 0 : index
    %c0_18 = arith.constant 0 : index
    %c0_19 = arith.constant 0 : index
    %38 = vector.load %arg6[%c0_17, %c0_18, %c0_19] : memref<1x1x128xf32, #tpu.memory_space<vmem>>, vector<1x1x128xf32>
    %39 = vector.shape_cast %38 : vector<1x1x128xf32> to vector<1x128xf32>
    %40 = vector.broadcast %32 : vector<1x1xf32> to vector<1x128xf32>
    %41 = arith.mulf %40, %39 : vector<1x128xf32>
    %cst_20 = arith.constant dense<0.000000e+00> : vector<128xf32>
    %42 = vector.multi_reduction <add>, %37, %cst_20 [0] : vector<8x128xf32> to vector<128xf32>
    %43 = vector.shape_cast %42 : vector<128xf32> to vector<1x128xf32>
    %44 = arith.addf %41, %43 : vector<1x128xf32>
    %c0_21 = arith.constant 0 : index
    %c0_22 = arith.constant 0 : index
    %c0_23 = arith.constant 0 : index
    %45 = vector.load %arg6[%c0_21, %c0_22, %c0_23] : memref<1x1x128xf32, #tpu.memory_space<vmem>>, vector<1x1x128xf32>
    %46 = vector.shape_cast %45 : vector<1x1x128xf32> to vector<1x128xf32>
    %47 = vector.shape_cast %44 : vector<1x128xf32> to vector<1x1x128xf32>
    tpu.vector_store %arg6[%c0_21, %c0_22, %c0_23], %47 {strides = array<i32>} : memref<1x1x128xf32, #tpu.memory_space<vmem>>, vector<1x1x128xf32>,
    %c0_24 = arith.constant 0 : index
    %c0_25 = arith.constant 0 : index
    %c0_26 = arith.constant 0 : index
    %48 = vector.load %arg7[%c0_24, %c0_25, %c0_26] : memref<1x128x16xf32, #tpu.memory_space<vmem>>, vector<1x128x16xf32>
    %49 = vector.shape_cast %48 : vector<1x128x16xf32> to vector<128x16xf32>
    %50 = vector.broadcast %32 : vector<1x1xf32> to vector<128x16xf32>
    %51 = arith.mulf %50, %49 : vector<128x16xf32>
    %cst_27 = arith.constant dense<0.000000e+00> : vector<128x16xf32>
    %52 = tpu.matmul %37, %6, %cst_27 {dimension_numbers = #tpu.dot_dimension_numbers<[0], [0], [1], [1], [0, 1, 1, 1], [], []>} : vector<8x128xf32>, vector<8x16xf32>, vector<128x16xf32> -> vector<128x16xf32>
    %53 = arith.addf %51, %52 : vector<128x16xf32>
    %c0_28 = arith.constant 0 : index
    %c0_29 = arith.constant 0 : index
    %c0_30 = arith.constant 0 : index
    %54 = vector.load %arg7[%c0_28, %c0_29, %c0_30] : memref<1x128x16xf32, #tpu.memory_space<vmem>>, vector<1x128x16xf32>
    %55 = vector.shape_cast %54 : vector<1x128x16xf32> to vector<128x16xf32>
    %56 = vector.shape_cast %53 : vector<128x16xf32> to vector<1x128x16xf32>
    tpu.vector_store %arg7[%c0_28, %c0_29, %c0_30], %56 {strides = array<i32>} : memref<1x128x16xf32, #tpu.memory_space<vmem>>, vector<1x128x16xf32>,
    %c0_31 = arith.constant 0 : index
    %c0_32 = arith.constant 0 : index
    %c0_33 = arith.constant 0 : index
    %57 = vector.load %arg8[%c0_31, %c0_32, %c0_33] : memref<1x1x16xf32, #tpu.memory_space<vmem>>, vector<1x1x16xf32>
    %58 = vector.shape_cast %57 : vector<1x1x16xf32> to vector<1x16xf32>
    %cst_34 = arith.constant dense<0.000000e+00> : vector<16xf32>
    %59 = vector.multi_reduction <add>, %6, %cst_34 [0] : vector<8x16xf32> to vector<16xf32>
    %60 = vector.shape_cast %59 : vector<16xf32> to vector<1x16xf32>
    %61 = arith.addf %58, %60 : vector<1x16xf32>
    %c0_35 = arith.constant 0 : index
    %c0_36 = arith.constant 0 : index
    %c0_37 = arith.constant 0 : index
    %62 = vector.load %arg8[%c0_35, %c0_36, %c0_37] : memref<1x1x16xf32, #tpu.memory_space<vmem>>, vector<1x1x16xf32>
    %63 = vector.shape_cast %62 : vector<1x1x16xf32> to vector<1x16xf32>
    %64 = vector.shape_cast %61 : vector<1x16xf32> to vector<1x1x16xf32>
    tpu.vector_store %arg8[%c0_35, %c0_36, %c0_37], %64 {strides = array<i32>} : memref<1x1x16xf32, #tpu.memory_space<vmem>>, vector<1x1x16xf32>,
    %c0_38 = arith.constant 0 : index
    %c0_39 = arith.constant 0 : index
    %c0_40 = arith.constant 0 : index
    %65 = vector.load %arg5[%c0_38, %c0_39, %c0_40] : memref<1x1x1xf32, #tpu.memory_space<vmem>>, vector<1x1x1xf32>
    %66 = vector.shape_cast %65 : vector<1x1x1xf32> to vector<1x1xf32>
    %67 = vector.shape_cast %30 : vector<1x1xf32> to vector<1x1x1xf32>
    tpu.vector_store %arg5[%c0_38, %c0_39, %c0_40], %67 {strides = array<i32>} : memref<1x1x1xf32, #tpu.memory_space<vmem>>, vector<1x1x1xf32>,
    return
  }
  func.func @transform_0(%arg0: i32, %arg1: i32) -> (i32, i32, i32) {
    %c0_i32 = arith.constant 0 : i32
    %c0_i32_0 = arith.constant 0 : i32
    return %arg0, %arg1, %c0_i32 : i32, i32, i32
  }
  func.func @transform_1(%arg0: i32, %arg1: i32) -> (i32, i32, i32) {
    %c0_i32 = arith.constant 0 : i32
    %c0_i32_0 = arith.constant 0 : i32
    return %arg0, %arg1, %c0_i32 : i32, i32, i32
  }
  func.func @transform_2(%arg0: i32, %arg1: i32) -> (i32, i32) {
    %c0_i32 = arith.constant 0 : i32
    %c0_i32_0 = arith.constant 0 : i32
    %c0_i32_1 = arith.constant 0 : i32
    return %c0_i32, %c0_i32_0 : i32, i32
  }
  func.func @transform_3(%arg0: i32, %arg1: i32) -> (i32, i32, i32) {
    %c0_i32 = arith.constant 0 : i32
    %c0_i32_0 = arith.constant 0 : i32
    %c0_i32_1 = arith.constant 0 : i32
    return %arg0, %c0_i32, %c0_i32_0 : i32, i32, i32
  }
  func.func @transform_4(%arg0: i32, %arg1: i32) -> (i32, i32, i32) {
    %c0_i32 = arith.constant 0 : i32
    %c0_i32_0 = arith.constant 0 : i32
    %c0_i32_1 = arith.constant 0 : i32
    return %arg0, %c0_i32, %c0_i32_0 : i32, i32, i32
  }
  func.func @transform_5(%arg0: i32, %arg1: i32) -> (i32, i32, i32) {
    %c0_i32 = arith.constant 0 : i32
    %c0_i32_0 = arith.constant 0 : i32
    %c0_i32_1 = arith.constant 0 : i32
    return %arg0, %c0_i32, %c0_i32_0 : i32, i32, i32
  }
  func.func @transform_6(%arg0: i32, %arg1: i32) -> (i32, i32, i32) {
    %c0_i32 = arith.constant 0 : i32
    %c0_i32_0 = arith.constant 0 : i32
    %c0_i32_1 = arith.constant 0 : i32
    return %arg0, %c0_i32, %c0_i32_0 : i32, i32, i32
  }
}

</mosaic_0001>

<bundles_post_ra>
// kernel: tpu_custom_call.1
= control target key start
LH: loop header
LB: loop body
LE: loop exit
PB: predicated region body
PF: predicated region fallthrough
CT: control target
= control target key end

     0   :  { %s1739_s0 = inlined_call_operand.vmem [shape: bf16[4,8,16], index: 0, kind: input, shape index: {}]   ;;  %s1740_s1 = inlined_call_operand.vmem [shape: f32[4,8,16], index: 1, kind: input, shape index: {}]   ;;  %s1741_s2 = inlined_call_operand.vmem [shape: bf16[128,16], index: 2, kind: input, shape index: {}]   ;;  %s1742_s3 = inlined_call_operand.vmem [shape: f32[4,1,1], index: 3, kind: output, shape index: {0}]   ;;  %s1743_s4 = inlined_call_operand.hbm [shape: f32[4,1,128], index: 4, kind: output, shape index: {1}]   ;;  %s1744_s5 = inlined_call_operand.vmem [shape: f32[4,128,16], index: 5, kind: output, shape index: {2}]   ;;  %s1745_s6 = inlined_call_operand.hbm [shape: f32[4,1,16], index: 6, kind: output, shape index: {3}]  }
   0x1   :  { %1747 = sst [smem:[#allocation8_spill]] %s1739_s0 }
   0x2   :  { %1748 = sst [smem:[#allocation9_spill]] %s1740_s1 }
   0x3   :  { %12 = vsyncpa [#allocation3], 0 }
   0x4   :  { %14 = vsyncpa [#allocation3 + $0x1], 0 }
   0x5   :  { %15 = vsyncpa [#allocation5], 0 }
   0x6   :  { %17 = vsyncpa [#allocation5 + $0x1], 0  ;;  %s1388_s21 = smov 0   ;;  %s1390_s22 = smov 0  }
   0x7   :  { %s1392_s23 = smov 0   ;;  %s1394_s24 = smov 0  }
   0x8   :  { %s1396_s25 = smov 0   ;;  %s1398_s26 = smov 0  }
   0x9 LB: > { %s1046_s27 = sadd.s32 4294967295, %s1345_s26   ;;  %s1047_s28 = sadd.s32 4294967294, %s1345_s26   ;;  %s1345_s26 = sphi %s1398_s26, %s23_s26   ;;  %s1341_s25 = sphi %s1396_s25, %s1758_s25   ;;  %s1337_s24 = sphi %s1394_s24, %s1757_s24   ;;  %s1333_s23 = sphi %s1392_s23, %s1756_s23   ;;  %s1329_s22 = sphi %s1390_s22, %s1755_s22   ;;  %s1325_s21 = sphi %s1388_s21, %s1754_s21  }
   0xa   : > { %s35_s29 = sadd.s32 1, %s1341_s25  ;;  %s145_s30 = sadd.s32 1, %s1333_s23 }
   0xb   : > { %p37_p0 = scmp.ge.s32.totalorder %s35_s29, 4  ;;  %p155_p1 = scmp.ne.s32.totalorder %s1333_s23, %s1329_s22 }
   0xc   : > { %p156_p2 = scmp.eq.s32.totalorder %s1046_s27, 3  ;;  %p161_p3 = scmp.ne.s32.totalorder %s1329_s22, %s1325_s21 }
   0xd   : > { %s1760_s29 = smov (%p37_p0, %s35_s29), 0  ;;  %p162_p5 = scmp.eq.s32.totalorder %s1047_s28, 3 }
   0xe   : > { %p1428_p4 = por %p156_p2, %p155_p1  ;;  %s142_s8 = ssub.s32 %s1341_s25, %s1760_s29 }
   0xf   : > { %p1050_p6 = scmp.ge.s32.totalorder %s1345_s26, 1  ;;  %p143_p7 = scmp.eq.s32.totalorder %s142_s8, 0 }
  0x10   : > { %p1435_p8 = por %p162_p5, %p161_p3  ;;  %p255_p9 = scmp.lt.s32.totalorder %s1345_s26, 5 }
  0x11   : > { %s1441_s10 = scalar_select %p143_p7, %s1333_s23, %s145_s30  }
  0x12   : > { %p256_p10 = pnand %p1050_p6, %p255_p9 }
  0x13   : > { %vm335_vm0 = vcmask (!%p256_p10), 130048   ;;  %v1347_v0 = vmov (!%p256_p10), 0.0   ;;  %v1223_v1 = vld [vmem:[%s1741_s2] sm:$0xff] (!%p256_p10)   ;;  %vm1348_vm1 = vmmov (!%p256_p10), 0   ;;  %p305_p11 = scmp.lt.s32.totalorder (!%p256_p10), %s1337_s24, 3  ;;  %v1224_v3 = vld [vmem:[%s1741_s2 + $0x8] sm:$0xff] (!%p256_p10)   ;;  %v487_v18 = vlaneseq (!%p256_p10) }
  0x14   : > { %259 = sbr.rel (%p256_p10) target bundleno = 1005 (0x3ed), region = 32  ;;  %1111 = vmatprep.subr.bf16.mxu0 (!%p256_p10), %v1347_v0  ;;  %1127 = vmatprep.mubr.msk.bf16.mxu0 (!%p256_p10), %vm1348_vm1, %v1347_v0  ;;  %v417_v2 = vsel (!%p256_p10), %vm335_vm0, %v1223_v1, 0  ;;  %v420_v4 = vsel (!%p256_p10), %vm335_vm0, %v1224_v3, 0  ;;  %v1225_v5 = vld [vmem:[%s1741_s2 + $0x10] sm:$0xff] (!%p256_p10)   ;;  %v1226_v7 = vld [vmem:[%s1741_s2 + $0x18] sm:$0xff] (!%p256_p10)   ;;  %v1227_v9 = vld [vmem:[%s1741_s2 + $0x20] sm:$0xff] (!%p256_p10)  }
  0x15   : > { %1112 = vmatpush3.bf16.xpose.msra.mxu0 (!%p256_p10), %v417_v2  ;;  %v423_v6 = vsel (!%p256_p10), %vm335_vm0, %v1225_v5, 0  ;;  %v426_v8 = vsel (!%p256_p10), %vm335_vm0, %v1226_v7, 0  ;;  %v429_v10 = vsel (!%p256_p10), %vm335_vm0, %v1227_v9, 0  ;;  %v1228_v11 = vld [vmem:[%s1741_s2 + $0x28] sm:$0xff] (!%p256_p10)   ;;  %v1229_v13 = vld [vmem:[%s1741_s2 + $0x30] sm:$0xff] (!%p256_p10)   ;;  %v1230_v15 = vld [vmem:[%s1741_s2 + $0x38] sm:$0xff] (!%p256_p10)  }
  0x16   : > { %1113 = vmatprep.subr.bf16.mxu0 (!%p256_p10), %v1347_v0  ;;  %v432_v12 = vsel (!%p256_p10), %vm335_vm0, %v1228_v11, 0  ;;  %v435_v14 = vsel (!%p256_p10), %vm335_vm0, %v1229_v13, 0  ;;  %v438_v16 = vsel (!%p256_p10), %vm335_vm0, %v1230_v15, 0  ;;  %s1751_s0 = sld [smem:[#allocation8_spill]] (!%p256_p10)  ;;  %v488_v19 = vand.u32 (!%p256_p10), 127, %v487_v18  ;;  %s1555_s13 = sand.u32 (!%p256_p10), 1, %s1329_s22  }
  0x17   : > { %vm332_vm3 = vcmask (!%p256_p10), 0   ;;  %v1349_v29 = vmov (!%p256_p10), -inf   ;;  %v1350_v30 = vmov (!%p256_p10), 0   ;;  %v509_v35 = vshrl.u32 (!%p256_p10), %v487_v18, 7  ;;  %s1558_s14 = scalar_lea.vmem (!%p256_p10), [#allocation2], %s1555_s13  ;;  %s1752_s1 = sld [smem:[#allocation9_spill]] (!%p256_p10) }
  0x18   : > { %vm489_vm2 = vcmp.lt.s32.totalorder (!%p256_p10), %v488_v19, 44  ;;  %1221 = vset.pattern.permute.xlu1 (!%p256_p10), %v1350_v30  ;;  %1222 = vset.pattern.permute.xlu0 (!%p256_p10), %v1350_v30  ;;  %334 = vst [vmem:[%s1558_s14] sm:$0x1] (!%p256_p10), %v1347_v0  ;;  %vm610_vm4 = vcmask (!%p256_p10), 64512   ;;  %vm352_vm5 = vcmask (!%p256_p10), 122880   ;;  %s1746_s27 = sshll.u32 (!%p256_p10), %s1337_s24, 4  ;;  %s877_s11 = sshll.u32 (!%p256_p10), %s1558_s14, 4  ;;  %s1600_s11 = int_to_ptr.vmem [resolvable:$true] %s877_s11 }
  0x19   : > { %v510_v40 = vsub.s32 (!%p256_p10), 0, %v509_v35  ;;  %s1597_s8 = scalar_lea.hbm (!%p256_p10), %s1743_s4, %s1746_s27  ;;  %s1351_s17 = smov (!%p256_p10), [#allocation2]  }
  0x1a   : > { %s1239_s18 = sshll.u32 (!%p256_p10), %s1351_s17, 4  ;;  %s1240_s18 = int_to_ptr.vmem [resolvable:$false] %s1239_s18 }
  0x1b   : > { %s1455_s15 = scalar_select %p305_p11, %s1337_s24, 3 }
  0x1c   : > { %p1242_p1 = scmp.lt.s32.totalorder %s1600_s11, %s1240_s18 }
  0x1d   : > { %s1084_s16 = sshll.u32 %s1455_s15, 7  ;;  %1114 = vmatpush3.bf16.xpose.msra.mxu0 %v420_v4  ;;  %s1051_s20 = sshll.u32 %s1455_s15, 2 }
  0x1e   : > { %s1462_s19 = scalar_lea.vmem %s1744_s5, %s1084_s16  ;;  %1115 = vmatprep.subr.bf16.mxu0 %v1347_v0  ;;  %s311_s30 = scalar_lea.vmem %s1751_s0, %s1051_s20 }
  0x1f   : > { %336 = vst.msk [vmem:[%s1462_s19] sm:$0xff] %vm335_vm0, %v1347_v0  ;;  %337 = vst.msk [vmem:[%s1462_s19 + $0x8] sm:$0xff] %vm335_vm0, %v1347_v0  ;;  %v354_v17 = vld [vmem:[%s311_s30] sm:$0xf]  ;;  %s321_s12 = scalar_lea.vmem %s1742_s3, %s1455_s15  ;;  %s1052_s16 = sshll.u32 %s1455_s15, 3 }
  0x20   : > { %338 = vst.msk [vmem:[%s1462_s19 + $0x10] sm:$0xff] %vm335_vm0, %v1347_v0  ;;  %339 = vst.msk [vmem:[%s1462_s19 + $0x18] sm:$0xff] %vm335_vm0, %v1347_v0  ;;  %v481_v20 = vunpack.c.l.bf16 %v354_v17  ;;  %s318_s20 = scalar_lea.vmem %s1752_s1, %s1052_s16  ;;  %v519_v60 = vld [vmem:[%s1558_s14] sm:$0x1]  ;;  %s1586_s15 = scalar_lea.vmem [#allocation4], %s1555_s13 }
  0x21   : > { %340 = vst.msk [vmem:[%s1462_s19 + $0x20] sm:$0xff] %vm335_vm0, %v1347_v0  ;;  %341 = vst.msk [vmem:[%s1462_s19 + $0x28] sm:$0xff] %vm335_vm0, %v1347_v0  ;;  %v355_v55 = vld [vmem:[%s318_s20] sm:$0xff]  ;;  %s1235_s16 = scalar_lea.vmem %s1600_s11, 16  ;;  %s1241_s20 = scalar_lea.vmem %s1240_s18, 32 }
  0x22   : > { %342 = vst.msk [vmem:[%s1462_s19 + $0x30] sm:$0xff] %vm335_vm0, %v1347_v0  ;;  %343 = vst.msk [vmem:[%s1462_s19 + $0x38] sm:$0xff] %vm335_vm0, %v1347_v0  ;;  %v482_v24 = vmul.f32 %v481_v20, %v481_v20  ;;  %1131 = vmatprep.subr.mxu1 %v355_v55  ;;  %v837_v19 = vsel %vm335_vm0, %v355_v55, 0.0  ;;  %p1236_p12 = scmp.ne.s32.totalorder %s1600_s11, %s1235_s16  ;;  %p1243_p2 = scmp.lt.s32.totalorder %s1241_s20, %s1235_s16 }
  0x23   : > { %344 = vst.msk [vmem:[%s1462_s19 + $0x40] sm:$0xff] %vm335_vm0, %v1347_v0  ;;  %345 = vst.msk [vmem:[%s1462_s19 + $0x48] sm:$0xff] %vm335_vm0, %v1347_v0  ;;  %1132 = vmatpush3.msra.mxu1 %v355_v55  ;;  %v838_v20 = vrot.slane %v837_v19, 4 }
  0x24   : > { %346 = vst.msk [vmem:[%s1462_s19 + $0x50] sm:$0xff] %vm335_vm0, %v1347_v0  ;;  %347 = vst.msk [vmem:[%s1462_s19 + $0x58] sm:$0xff] %vm335_vm0, %v1347_v0  ;;  %v483_v28 = vsel %vm335_vm0, %v482_v24, 0.0  ;;  %p1237_p13 = pnand %p1236_p12, %p1428_p4  ;;  %p1244_p3 = por %p1243_p2, %p1242_p1 }
  0x25   : > { %348 = vst.msk [vmem:[%s1462_s19 + $0x60] sm:$0xff] %vm335_vm0, %v1347_v0  ;;  %349 = vst.msk [vmem:[%s1462_s19 + $0x68] sm:$0xff] %vm335_vm0, %v1347_v0  ;;  %1116 = vmatpush3.bf16.xpose.msra.mxu0 %v423_v6 }
  0x26   : > { %350 = vst.msk [vmem:[%s1462_s19 + $0x70] sm:$0xff] %vm335_vm0, %v1347_v0  ;;  %351 = vst.msk [vmem:[%s1462_s19 + $0x78] sm:$0xff] %vm335_vm0, %v1347_v0  ;;  %1117 = vmatprep.subr.bf16.mxu0 %v1347_v0  ;;  %p1238_p0 = pneg %p1237_p13 }
  0x27   : > { %333 = vst.msk [vmem:[%s321_s12] sm:$0x1] %vm332_vm3, %v1349_v29 }
  0x28   : > { %353 = vst.msk [vmem:[%s1586_s15] sm:$0x1] %vm352_vm5, %v1347_v0  ;;  %p1245_p5 = pnand %p1244_p3, %p1238_p0 }
  0x2d   : > { %1118 = vmatpush3.bf16.xpose.msra.mxu0 %v426_v8 }
  0x2e   : > { %1119 = vmatprep.subr.bf16.mxu0 %v1347_v0  ;;  %v501_v38 = vld [vmem:[%s321_s12] sm:$0x1] }
  0x35   : > { %1120 = vmatpush3.bf16.xpose.msra.mxu0 %v429_v10 }
  0x36   : > { %1121 = vmatprep.subr.bf16.mxu0 %v1347_v0 }
  0x3d   : > { %1122 = vmatpush3.bf16.xpose.msra.mxu0 %v432_v12 }
  0x3e   : > { %1123 = vmatprep.subr.bf16.mxu0 %v1347_v0 }
  0x45   : > { %1124 = vmatpush3.bf16.xpose.msra.mxu0 %v435_v14 }
  0x46   : > { %1125 = vmatprep.subr.bf16.mxu0 %v1347_v0 }
  0x4d   : > { %1126 = vmatpush3.bf16.xpose.msra.mxu0 %v438_v16 }
  0x54   : > { %1128 = vmatmul.mubr.msk.bf16.vlgmr.msra.gmra.mrb[0].mxu0 %vm335_vm0, %v354_v17 }
 0x127   : > { %v474_v21 = vpop.f32.mrb[0].mxu0 }
 0x128   : > { %v480_v22 = vmul.f32 0.5, %v474_v21  ;;  %v1129_v23 = vpop.f32.mrb[1].mxu0  ;;  %v839_v21 = vadd.f32 %v838_v20, %v837_v19 }
 0x129   : > { %v477_v25 = vpop.f32.mrb[2].mxu0 }
 0x12a   : > { %v1130_v26 = vpop.f32.mrb[3].mxu0  ;;  %v492_v27 = vsel %vm489_vm2, %v480_v22, -inf  ;;  %v840_v22 = vrot.slane %v839_v21, 2 }
 0x12b   : > { %493 = vmax.xlane.f32.xlu0 %v492_v27  ;;  %v836_v26 = vld [vmem:[%s1586_s15] sm:$0x1] }
 0x12c   : > { %v841_v23 = vadd.f32 %v840_v22, %v839_v21 }
 0x12e   : > { %v842_v24 = vrot.slane %v841_v23, 1 }
 0x12f   : > { %484 = vadd.xlane.f32.xlu0 %v483_v28 }
 0x130   : > { %v843_v25 = vadd.f32 %v842_v24, %v841_v23 }
 0x1b8   : > { %v494_v31 = vpop.xlane.xlu0 %493 }
 0x1b9   : > { %v495_v32 = vrot.slane %v494_v31, 4 }
 0x1bb   : > { %v496_v33 = vmax.f32 %v494_v31, %v495_v32 }
 0x1bc   : > { %v485_v46 = vpop.xlane.xlu0 %484 }
 0x1bd   : > { %v497_v34 = vrot.slane %v496_v33, 2  ;;  %v486_v47 = vmul.f32 0.125, %v485_v46 }
 0x1bf   : > { %v498_v36 = vmax.f32 %v496_v33, %v497_v34  ;;  %v506_v48 = vsub.f32 %v492_v27, %v486_v47  ;;  %v844_v27 = vadd.f32 %v843_v25, %v836_v26 }
 0x1c1   : > { %v499_v37 = vrot.slane %v498_v36, 1  ;;  %846 = vst.msk [vmem:[%s1586_s15] sm:$0x1] %vm352_vm5, %v844_v27 }
 0x1c3   : > { %v500_v39 = vmax.f32 %v498_v36, %v499_v37 }
 0x1c5   : > { %v502_v41 = vmax.f32 %v501_v38, %v500_v39 }
 0x1c7   : > { %v511_v42 = vrot.slane %v502_v41, %v510_v40  ;;  %848 = vst.msk [vmem:[%s321_s12] sm:$0x1] %vm332_vm3, %v502_v41  ;;  %v503_v43 = vsub.f32 %v501_v38, %v502_v41  ;;  %s853_s12 = scalar_lea.sflag [#allocation3], %s1555_s13 }
 0x1c9   : > { %513 = vperm.xlu1 %1221, %v511_v42   ;;  %v504_v44 = vmul.f32 1.442695, %v503_v43 }
 0x1cb   : > { %1231 = vpow2.f32 %v504_v44 }
 0x1d5   : > { %v1232_v45 = vpop.eup %1231 }
 0x1d6   : > { %522 = vperm.xlu0 %1222, %v1232_v45   ;;  %v557_v2 = vrot.slane %v1232_v45, %v510_v40 }
 0x248   : > { %v514_v49 = vpop.permute.xlu1 %513 }
 0x249   : > { %v516_v50 = vsub.f32 %v506_v48, %v514_v49 }
 0x24b   : > { %v517_v51 = vmul.f32 1.442695, %v516_v50 }
 0x24d   : > { %1233 = vpow2.f32 %v517_v51 }
 0x255   : > { %v523_v56 = vpop.permute.xlu0 %522 }
 0x256   : > { %v528_v59 = vrot.slane %v523_v56, %v510_v40 }
 0x257   : > { %v1234_v52 = vpop.eup %1233 }
 0x258   : > { %v530_v53 = vrot.slane %v1234_v52, 4  ;;  %578 = vxpose.xlu1.b32.start.end [1/1] (short) %v1234_v52, 128  ;;  %v529_v63 = vmul.f32 %v528_v59, %v519_v60 }
 0x25a   : > { %v531_v54 = vadd.f32 %v1234_v52, %v530_v53 }
 0x25c   : > { %v532_v57 = vrot.slane %v531_v54, 2 }
 0x25e   : > { %v533_v58 = vadd.f32 %v532_v57, %v531_v54 }
 0x260   : > { %v534_v61 = vrot.slane %v533_v58, 1 }
 0x262   : > { %v535_v62 = vadd.f32 %v534_v61, %v533_v58 }
 0x264   : > { %v536_v1 = vadd.f32 %v535_v62, %v529_v63 }
 0x266   : > { %537 = vst [vmem:[%s1558_s14] sm:$0x1] %v536_v1 }
 0x2b2   : > { %559 = vperm.xlu1 %1221, %v557_v2  }
 0x2d8   : > { %v594_v3 = vpop.trf.xlu1 }
 0x2d9   : > { %1133 = vmatprep.mubr.msk.f32.mxu1 %vm610_vm4, %v594_v3 }
 0x2dc   : > { %v595_v4 = vpop.trf.xlu1 }
 0x2dd   : > { %1134 = vmatmul.mubr.msk.f32.vlgmr.msra.gmra.mrb[0].mxu1 %vm610_vm4, %v595_v4 }
 0x2e0   : > { %v596_v5 = vpop.trf.xlu1 }
 0x2e1   : > { %1136 = vmatprep.mubr.msk.f32.mxu1 %vm610_vm4, %v596_v5 }
 0x2e4   : > { %v597_v6 = vpop.trf.xlu1 }
 0x2e5   : > { %1137 = vmatmul.mubr.msk.f32.gmra.mrb[2].mxu1 %vm610_vm4, %v597_v6 }
 0x2e8   : > { %v598_v7 = vpop.trf.xlu1 }
 0x2e9   : > { %1139 = vmatprep.mubr.msk.f32.mxu1 %vm610_vm4, %v598_v7 }
 0x2ec   : > { %v599_v8 = vpop.trf.xlu1 }
 0x2ed   : > { %1140 = vmatmul.mubr.msk.f32.gmra.mrb[4].mxu1 %vm610_vm4, %v599_v8 }
 0x2f0   : > { %v600_v9 = vpop.trf.xlu1 }
 0x2f1   : > { %1142 = vmatprep.mubr.msk.f32.mxu1 %vm610_vm4, %v600_v9 }
 0x2f4   : > { %v601_v10 = vpop.trf.xlu1 }
 0x2f5   : > { %1143 = vmatmul.mubr.msk.f32.gmra.mrb[6].mxu1 %vm610_vm4, %v601_v10 }
 0x2f8   : > { %v602_v11 = vpop.trf.xlu1 }
 0x2f9   : > { %1145 = vmatprep.mubr.msk.f32.mxu1 %vm610_vm4, %v602_v11 }
 0x2fc   : > { %v603_v12 = vpop.trf.xlu1 }
 0x2fd   : > { %1146 = vmatmul.mubr.msk.f32.gmra.mrb[8].mxu1 %vm610_vm4, %v603_v12 }
 0x300   : > { %v604_v13 = vpop.trf.xlu1 }
 0x301   : > { %1148 = vmatprep.mubr.msk.f32.mxu1 %vm610_vm4, %v604_v13 }
 0x304   : > { %v605_v14 = vpop.trf.xlu1 }
 0x305   : > { %1149 = vmatmul.mubr.msk.f32.gmra.mrb[10].mxu1 %vm610_vm4, %v605_v14 }
 0x308   : > { %v606_v15 = vpop.trf.xlu1 }
 0x309   : > { %1151 = vmatprep.mubr.msk.f32.mxu1 %vm610_vm4, %v606_v15 }
 0x30c   : > { %v607_v16 = vpop.trf.xlu1 }
 0x30d   : > { %1152 = vmatmul.mubr.msk.f32.gmra.mrb[12].mxu1 %vm610_vm4, %v607_v16 }
 0x310   : > { %v608_v17 = vpop.trf.xlu1 }
 0x311   : > { %1154 = vmatprep.mubr.msk.f32.mxu1 %vm610_vm4, %v608_v17 }
 0x314   : > { %v609_v18 = vpop.trf.xlu1 }
 0x315   : > { %1155 = vmatmul.mubr.msk.f32.gmra.mrb[14].mxu1 %vm610_vm4, %v609_v18 }
 0x316   : > { %1248 = shalt.err (!%p1245_p5)
}
 0x317   : > { %s1249_s14 = scalar_lea.hbm %s1597_s8, 16  ;;  %s1253_s17 = scalar_lea.hbm %s1743_s4, 64 }
 0x318   : > { %p1250_p6 = scmp.ne.s32.totalorder %s1597_s8, %s1249_s14  ;;  %p1254_p10 = scmp.lt.u32.totalorder %s1597_s8, %s1743_s4 }
 0x319   : > { %p1255_p11 = scmp.lt.u32.totalorder %s1253_s17, %s1249_s14  ;;  %p1257_p13 = scmp.lt.u32.totalorder %s1249_s14, %s1597_s8 }
 0x31a   : > { %p1251_p7 = pnand %p1250_p6, %p1428_p4 }
 0x31b   : > { %p1256_p12 = por %p1255_p11, %p1254_p10 }
 0x31c   : > { %p1252_p9 = pneg %p1251_p7 }
 0x31d   : > { %p1258_p0 = por %p1257_p13, %p1256_p12 }
 0x31f   : > { %p1259_p1 = pnand %p1258_p0, %p1252_p9 }
 0x321   : > { %1262 = shalt.err (!%p1259_p1)
}
 0x322   : > { %1157 = dma.vmem_to_hbm [thread:$0]  (%p1428_p4), %s1600_s11, 16, %s1597_s8, %s853_s12  }
 0x323   : > { %s1753_s16 = sshll.u32 %s1337_s24, 4  ;;  %s893_s30 = sshll.u32 %s1586_s15, 4  ;;  %s894_s30 = int_to_ptr.vmem [resolvable:$true] %s893_s30 }
 0x324   : > { %s1630_s27 = scalar_lea.hbm %s1745_s6, %s1753_s16  ;;  %s862_s14 = scalar_lea.sflag [#allocation5], %s1555_s13 }
 0x325   : > { %s1263_s17 = scalar_lea.vmem %s894_s30, 16  ;;  %s1352_s18 = smov [#allocation4]  }
 0x326   : > { %p1264_p2 = scmp.ne.s32.totalorder %s894_s30, %s1263_s17  ;;  %s1267_s0 = sshll.u32 %s1352_s18, 4  ;;  %s1268_s0 = int_to_ptr.vmem [resolvable:$false] %s1267_s0 }
 0x327   : > { %s1269_s1 = scalar_lea.vmem %s1268_s0, 32  ;;  %p1270_p6 = scmp.lt.s32.totalorder %s894_s30, %s1268_s0 }
 0x328   : > { %p1265_p3 = pnand %p1264_p2, %p1428_p4  ;;  %p1271_p7 = scmp.lt.s32.totalorder %s1269_s1, %s1263_s17 }
 0x32a   : > { %p1266_p5 = pneg %p1265_p3  ;;  %p1272_p9 = por %p1271_p7, %p1270_p6 }
 0x32c   : > { %p1273_p10 = pnand %p1272_p9, %p1266_p5 }
 0x32e   : > { %1276 = shalt.err (!%p1273_p10)
}
 0x32f   : > { %s1277_s24 = scalar_lea.hbm %s1630_s27, 16  ;;  %s1281_s8 = scalar_lea.hbm %s1745_s6, 64 }
 0x330   : > { %p1278_p11 = scmp.ne.s32.totalorder %s1630_s27, %s1277_s24  ;;  %p1282_p0 = scmp.lt.u32.totalorder %s1630_s27, %s1745_s6 }
 0x331   : > { %p1283_p1 = scmp.lt.u32.totalorder %s1281_s8, %s1277_s24  ;;  %p1285_p3 = scmp.lt.u32.totalorder %s1277_s24, %s1630_s27 }
 0x332   : > { %p1279_p12 = pnand %p1278_p11, %p1428_p4 }
 0x333   : > { %p1284_p2 = por %p1283_p1, %p1282_p0 }
 0x334   : > { %p1280_p13 = pneg %p1279_p12 }
 0x335   : > { %p1286_p5 = por %p1285_p3, %p1284_p2 }
 0x337   : > { %p1287_p6 = pnand %p1286_p5, %p1280_p13 }
 0x339   : > { %1290 = shalt.err (!%p1287_p6)
}
 0x33a   : > { %1158 = dma.vmem_to_hbm [thread:$0]  (%p1428_p4), %s894_s30, 16, %s1630_s27, %s862_s14   ;;  %v1651_v0 = vpop.permute.xlu1 %559  ;;  %v539_v28 = vld [vmem:[%s1462_s19 + $0x8] sm:$0xff]  ;;  %v538_v29 = vld [vmem:[%s1462_s19] sm:$0xff]  ;;  %v541_v36 = vld [vmem:[%s1462_s19 + $0x18] sm:$0xff] }
 0x33b   : > { %v563_v30 = vmul.f32 %v1651_v0, %v539_v28  ;;  %v562_v32 = vmul.f32 %v1651_v0, %v538_v29  ;;  %v540_v37 = vld [vmem:[%s1462_s19 + $0x10] sm:$0xff]  ;;  %v565_v38 = vmul.f32 %v1651_v0, %v541_v36  ;;  %v543_v44 = vld [vmem:[%s1462_s19 + $0x28] sm:$0xff]  ;;  %v542_v45 = vld [vmem:[%s1462_s19 + $0x20] sm:$0xff] }
 0x33c   : > { %v564_v40 = vmul.f32 %v1651_v0, %v540_v37  ;;  %v567_v46 = vmul.f32 %v1651_v0, %v543_v44  ;;  %v566_v48 = vmul.f32 %v1651_v0, %v542_v45  ;;  %v545_v52 = vld [vmem:[%s1462_s19 + $0x38] sm:$0xff]  ;;  %v544_v53 = vld [vmem:[%s1462_s19 + $0x30] sm:$0xff]  ;;  %v547_v60 = vld [vmem:[%s1462_s19 + $0x48] sm:$0xff] }
 0x33d   : > { %v569_v54 = vmul.f32 %v1651_v0, %v545_v52  ;;  %v568_v56 = vmul.f32 %v1651_v0, %v544_v53  ;;  %v546_v61 = vld [vmem:[%s1462_s19 + $0x40] sm:$0xff]  ;;  %v571_v62 = vmul.f32 %v1651_v0, %v547_v60  ;;  %v549_v5 = vld [vmem:[%s1462_s19 + $0x58] sm:$0xff]  ;;  %v548_v6 = vld [vmem:[%s1462_s19 + $0x50] sm:$0xff] }
 0x33e   : > { %v570_v1 = vmul.f32 %v1651_v0, %v546_v61  ;;  %v573_v7 = vmul.f32 %v1651_v0, %v549_v5  ;;  %v572_v9 = vmul.f32 %v1651_v0, %v548_v6  ;;  %v551_v13 = vld [vmem:[%s1462_s19 + $0x68] sm:$0xff]  ;;  %v550_v14 = vld [vmem:[%s1462_s19 + $0x60] sm:$0xff]  ;;  %v553_v21 = vld [vmem:[%s1462_s19 + $0x78] sm:$0xff] }
 0x33f   : > { %v575_v15 = vmul.f32 %v1651_v0, %v551_v13  ;;  %v574_v17 = vmul.f32 %v1651_v0, %v550_v14  ;;  %v552_v22 = vld [vmem:[%s1462_s19 + $0x70] sm:$0xff]  ;;  %v577_v23 = vmul.f32 %v1651_v0, %v553_v21 }
 0x340   : > { %v576_v25 = vmul.f32 %v1651_v0, %v552_v22 }
 0x3b0   : > { %v1135_v31 = vpop.f32.mrb[0].mxu1 }
 0x3b1   : > { %v805_v33 = vadd.f32 %v1135_v31, %v563_v30  ;;  %v725_v34 = vpop.f32.mrb[1].mxu1 }
 0x3b2   : > { %v804_v35 = vadd.f32 %v725_v34, %v562_v32 }
 0x3b3   : > { %821 = vst.msk [vmem:[%s1462_s19 + $0x8] sm:$0xff] %vm335_vm0, %v805_v33 }
 0x3b4   : > { %820 = vst.msk [vmem:[%s1462_s19] sm:$0xff] %vm335_vm0, %v804_v35 }
 0x3b8   : > { %v1138_v39 = vpop.f32.mrb[2].mxu1 }
 0x3b9   : > { %v807_v41 = vadd.f32 %v1138_v39, %v565_v38  ;;  %v735_v42 = vpop.f32.mrb[3].mxu1 }
 0x3ba   : > { %v806_v43 = vadd.f32 %v735_v42, %v564_v40 }
 0x3bb   : > { %823 = vst.msk [vmem:[%s1462_s19 + $0x18] sm:$0xff] %vm335_vm0, %v807_v41 }
 0x3bc   : > { %822 = vst.msk [vmem:[%s1462_s19 + $0x10] sm:$0xff] %vm335_vm0, %v806_v43 }
 0x3c0   : > { %v1141_v47 = vpop.f32.mrb[4].mxu1 }
 0x3c1   : > { %v809_v49 = vadd.f32 %v1141_v47, %v567_v46  ;;  %v745_v50 = vpop.f32.mrb[5].mxu1 }
 0x3c2   : > { %v808_v51 = vadd.f32 %v745_v50, %v566_v48 }
 0x3c3   : > { %825 = vst.msk [vmem:[%s1462_s19 + $0x28] sm:$0xff] %vm335_vm0, %v809_v49 }
 0x3c4   : > { %824 = vst.msk [vmem:[%s1462_s19 + $0x20] sm:$0xff] %vm335_vm0, %v808_v51 }
 0x3c8   : > { %v1144_v55 = vpop.f32.mrb[6].mxu1 }
 0x3c9   : > { %v811_v57 = vadd.f32 %v1144_v55, %v569_v54  ;;  %v755_v58 = vpop.f32.mrb[7].mxu1 }
 0x3ca   : > { %v810_v59 = vadd.f32 %v755_v58, %v568_v56 }
 0x3cb   : > { %827 = vst.msk [vmem:[%s1462_s19 + $0x38] sm:$0xff] %vm335_vm0, %v811_v57 }
 0x3cc   : > { %826 = vst.msk [vmem:[%s1462_s19 + $0x30] sm:$0xff] %vm335_vm0, %v810_v59 }
 0x3d0   : > { %v1147_v63 = vpop.f32.mrb[8].mxu1 }
 0x3d1   : > { %v813_v2 = vadd.f32 %v1147_v63, %v571_v62  ;;  %v765_v3 = vpop.f32.mrb[9].mxu1 }
 0x3d2   : > { %v812_v4 = vadd.f32 %v765_v3, %v570_v1 }
 0x3d3   : > { %829 = vst.msk [vmem:[%s1462_s19 + $0x48] sm:$0xff] %vm335_vm0, %v813_v2 }
 0x3d4   : > { %828 = vst.msk [vmem:[%s1462_s19 + $0x40] sm:$0xff] %vm335_vm0, %v812_v4 }
 0x3d8   : > { %v1150_v8 = vpop.f32.mrb[10].mxu1 }
 0x3d9   : > { %v815_v10 = vadd.f32 %v1150_v8, %v573_v7  ;;  %v775_v11 = vpop.f32.mrb[11].mxu1 }
 0x3da   : > { %v814_v12 = vadd.f32 %v775_v11, %v572_v9 }
 0x3db   : > { %831 = vst.msk [vmem:[%s1462_s19 + $0x58] sm:$0xff] %vm335_vm0, %v815_v10 }
 0x3dc   : > { %830 = vst.msk [vmem:[%s1462_s19 + $0x50] sm:$0xff] %vm335_vm0, %v814_v12 }
 0x3e0   : > { %v1153_v16 = vpop.f32.mrb[12].mxu1 }
 0x3e1   : > { %v817_v18 = vadd.f32 %v1153_v16, %v575_v15  ;;  %v785_v19 = vpop.f32.mrb[13].mxu1 }
 0x3e2   : > { %v816_v20 = vadd.f32 %v785_v19, %v574_v17 }
 0x3e3   : > { %833 = vst.msk [vmem:[%s1462_s19 + $0x68] sm:$0xff] %vm335_vm0, %v817_v18 }
 0x3e4   : > { %832 = vst.msk [vmem:[%s1462_s19 + $0x60] sm:$0xff] %vm335_vm0, %v816_v20 }
 0x3e8   : > { %v1156_v24 = vpop.f32.mrb[14].mxu1 }
 0x3e9   : > { %v819_v26 = vadd.f32 %v1156_v24, %v577_v23  ;;  %v795_v27 = vpop.f32.mrb[15].mxu1 }
 0x3ea   : > { %v818_v28 = vadd.f32 %v795_v27, %v576_v25 }
 0x3eb   : > { %835 = vst.msk [vmem:[%s1462_s19 + $0x78] sm:$0xff] %vm335_vm0, %v819_v26 }
 0x3ec   : > { %834 = vst.msk [vmem:[%s1462_s19 + $0x70] sm:$0xff] %vm335_vm0, %v818_v28 }
 0x3ed PF: > { %p1168_p4 = scmp.ge.s32.totalorder %s1345_s26, 2  ;;  %s911_s1 = sand.u32 1, %s1325_s21  }
 0x3ee   : > { %s912_s7 = scalar_lea.sflag [#allocation3], %s911_s1 }
 0x3ef   : > { %p1162_p7 = pnand %p1168_p4, %p1435_p8 }
 0x3f1   : > { %1316 = dma.done.wait (!%p1162_p7), %s912_s7, 16  }
 0x3f2   : > { %1318 = vsyncadd (!%p1162_p7), %s912_s7, 4294967280  ;;  %s928_s12 = scalar_lea.sflag [#allocation5], %s911_s1 }
 0x3f3   : > { %1320 = dma.done.wait (!%p1162_p7), %s928_s12, 16  }
 0x3f4   : > { %1322 = vsyncadd (!%p1162_p7), %s928_s12, 4294967280  ;;  %s23_s26 = sadd.s32 1, %s1345_s26   ;;  %s1754_s21 = smov %s1329_s22 }
 0x3f5   : > { %p20_p9 = scmp.ge.s32.totalorder %s23_s26, 6   ;;  %s1755_s22 = smov %s1333_s23 }
 0x3f6   : > { %s1756_s23 = smov %s1441_s10  ;;  %s1757_s24 = smov %s1341_s25 }
 0x3f7   : > { %s1758_s25 = smov %s1760_s29  ;;  %22 = sbr.rel (!%p20_p9) target bundleno = 9 (0x9), region = 115 }
 0x3fe   :  { %932 = vsyncpa [#allocation3], 1 }
 0x3ff   :  { %934 = vsyncpa [#allocation3 + $0x1], 1 }
 0x400   :  { %935 = vsyncpa [#allocation5], 1 }
 0x401   :  { %937 = vsyncpa [#allocation5 + $0x1], 1 }

</bundles_post_ra>
